<compile_context>
chip_gen: v6e
topology: v6e:2x2x1
jax: 0.10.0
libtpu: 0.0.40
codegen_flags: <defaults>
</compile_context>

<pallas_src>
import jax
import jax.numpy as jnp
from jax import lax
from jax.experimental import pallas as pl
from jax.experimental.pallas import tpu as pltpu


def _make_graphnet_kernel(precision):
    def _graphnet_kernel(l_ref, x_ref, w1_ref, b1_ref, w2_ref, b2_ref, o_ref):
        # l_ref : (N, N)        normalized Laplacian (precomputed, shared, resident)
        # x_ref : (Fin, N, TB)  batch packed into lanes (TB = batch tile, multiple of 128)
        # w1_ref: (H, Fin)  SMEM    b1_ref: (H,)    SMEM
        # w2_ref: (Fout, H) SMEM    b2_ref: (Fout,) SMEM
        # o_ref : (Fout, N, TB)
        Fin = x_ref.shape[0]
        H = w1_ref.shape[0]
        Fout = w2_ref.shape[0]

        L = l_ref[...]                                       # (N, N)

        # ---- stage 1 MXU: g[f] = L @ X[f], lanes = batch tile ----
        g = [
            jnp.dot(L, x_ref[f], preferred_element_type=jnp.float32,
                    precision=precision)
            for f in range(Fin)
        ]                                                    # Fin x (N, TB)

        # ---- fused gconv1 feature contraction + ReLU + streamed W2 fold (VPU) ----
        # hc[k] = sum_j w2[k, j] * relu(sum_f w1[j, f] * g[f] + b1[j])
        # Each h_j slab dies immediately after being folded into the Fout accumulators.
        hc = [None] * Fout
        for j in range(H):
            acc = g[0] * w1_ref[j, 0]
            for f in range(1, Fin):
                acc = acc + g[f] * w1_ref[j, f]
            h_j = jnp.maximum(acc + b1_ref[j], 0.0)          # (N, TB)
            for k in range(Fout):
                term = h_j * w2_ref[k, j]
                hc[k] = term if hc[k] is None else hc[k] + term

        # ---- stage 2 MXU: out[k] = L @ hc[k] + b2[k]  (only Fout matmuls) ----
        for k in range(Fout):
            ok = jnp.dot(L, hc[k], preferred_element_type=jnp.float32,
                         precision=precision)
            o_ref[k] = (ok + b2_ref[k]).astype(o_ref.dtype)  # full-width (N, TB) store

    return _graphnet_kernel


def _round_up(x, m):
    return (x + m - 1) // m * m


def _pick_batch_tile(Bp, max_tile):
    """Bp is a multiple of 128.  Pick TB = 128*d with d | (Bp//128) and TB <= max_tile,
    preferring >= 2 grid steps (v7x: both TensorCores; all gens: DMA/compute overlap)."""
    nb = Bp // 128
    best = 128
    for d in range(1, nb + 1):
        if nb % d != 0:
            continue
        tb = 128 * d
        if tb > max_tile:
            break
        if nb // d >= 2 or nb == 1:
            best = tb
    return best


def graphnet_forward_packed(Xp, A_hat, w1, b1, w2, b2, *, max_batch_tile=2048,
                            precision=lax.Precision.HIGHEST):
    """Canonical packed entry point (no transposes around the kernel).

    Xp: (Fin, N, Bp) float32, batch packed into the lane axis, Bp a multiple of 128
        (zero-pad the batch tail).  Returns (Fout, N, Bp) float32.
    """
    Fin, N, Bp = Xp.shape
    assert Bp % 128 == 0, "packed batch must be padded to a multiple of 128 lanes"
    H = w1.shape[0]
    Fout = w2.shape[0]

    # --- Laplacian hoisted out of the kernel (tiny (N, N) op; EUP rsqrt) ---
    A = jnp.asarray(A_hat, jnp.float32)
    d = lax.rsqrt(jnp.sum(A, axis=0) + 1e-5)      # == torch.sum(A_hat_batched, dim=1)
    Lap = d[:, None] * A * d[None, :]             # (N, N)

    TB = _pick_batch_tile(Bp, max_batch_tile)

    return pl.pallas_call(
        _make_graphnet_kernel(precision),
        out_shape=jax.ShapeDtypeStruct((Fout, N, Bp), jnp.float32),
        grid_spec=pltpu.PrefetchScalarGridSpec(
            num_scalar_prefetch=0,
            grid=(Bp // TB,),
            in_specs=[
                pl.BlockSpec((N, N), lambda i: (0, 0)),            # L (resident)
                pl.BlockSpec((Fin, N, TB), lambda i: (0, 0, i)),   # X batch tile
                pl.BlockSpec(memory_space=pltpu.MemorySpace.SMEM),  # W1 (H, Fin)
                pl.BlockSpec(memory_space=pltpu.MemorySpace.SMEM),  # b1 (H,)
                pl.BlockSpec(memory_space=pltpu.MemorySpace.SMEM),  # W2 (Fout, H)
                pl.BlockSpec(memory_space=pltpu.MemorySpace.SMEM),  # b2 (Fout,)
            ],
            out_specs=pl.BlockSpec((Fout, N, TB), lambda i: (0, 0, i)),
        ),
        compiler_params=pltpu.CompilerParams(
            dimension_semantics=("parallel",)),
    )(Lap, Xp,
      jnp.asarray(w1, jnp.float32), jnp.asarray(b1, jnp.float32),
      jnp.asarray(w2, jnp.float32), jnp.asarray(b2, jnp.float32))


def graphnet_forward(X, A_hat, w1, b1, w2, b2, *, max_batch_tile=2048,
                     precision=lax.Precision.HIGHEST, min_pallas_batch=0):
    """Convenience (B, N, Fin) -> (B, N, Fout) wrapper.

    Packs the batch into lanes exactly once on entry and unpacks once on exit.  Inside
    a GraFormer network, prefer graphnet_forward_packed and keep the (F, N, B) layout
    as the canonical activation layout across layers to avoid these transposes.
    """
    B, N, Fin = X.shape

    if B < min_pallas_batch:
        # Tiny-batch fallback: launch/transpose overhead dominates the ~10 KB problem.
        return _reference_forward(jnp.asarray(X, jnp.float32), jnp.asarray(A_hat, jnp.float32),
                                  jnp.asarray(w1, jnp.float32), jnp.asarray(b1, jnp.float32),
                                  jnp.asarray(w2, jnp.float32), jnp.asarray(b2, jnp.float32))

    # --- pack batch into lanes: (B, N, Fin) -> (Fin, N, Bp), Bp = round_up(B, 128) ---
    Bp = _round_up(max(B, 1), 128)
    Xp = jnp.transpose(jnp.asarray(X, jnp.float32), (2, 1, 0))   # (Fin, N, B)
    if Bp != B:
        Xp = jnp.pad(Xp, ((0, 0), (0, 0), (0, Bp - B)))          # zero-pad batch lanes

    out = graphnet_forward_packed(Xp, A_hat, w1, b1, w2, b2,
                                  max_batch_tile=max_batch_tile, precision=precision)

    # (Fout, N, Bp) -> (B, N, Fout)
    return jnp.transpose(out[:, :, :B], (2, 1, 0))


def _reference_forward(X, A_hat, w1, b1, w2, b2):
    # pure-JAX reference mirroring the PyTorch module (full f32 precision)
    hp = lax.Precision.HIGHEST
    d = lax.rsqrt(jnp.sum(A_hat, axis=0) + 1e-5)
    L = d[:, None] * A_hat * d[None, :]
    h = jnp.einsum("ij,bjf->bif", L, X, precision=hp)
    h = jnp.maximum(jnp.einsum("bif,hf->bih", h, w1, precision=hp) + b1, 0.0)
    h2 = jnp.einsum("ij,bjf->bif", L, h, precision=hp)
    return jnp.einsum("bih,oh->bio", h2, w2, precision=hp) + b2


if __name__ == "__main__":
    # Module defaults: in_features=2, out_features=2, n_pts=21.
    N, Fin, Fout = 21, 2, 2
    H = Fin * 2  # hidden features of gconv1

    key = jax.random.PRNGKey(0)
    k_x, k_a, k_w1, k_b1, k_w2, k_b2 = jax.random.split(key, 6)

    # eye + small non-negative, non-symmetric perturbation: exercises the degree-axis
    # choice in the Laplacian, which a plain identity A_hat cannot.
    A_hat = jnp.eye(N, dtype=jnp.float32) + 0.05 * jax.random.uniform(
        k_a, (N, N), dtype=jnp.float32)
    w1 = jax.random.normal(k_w1, (H, Fin), dtype=jnp.float32) * 0.1   # Linear(Fin -> 2*Fin)
    b1 = jax.random.normal(k_b1, (H,), dtype=jnp.float32) * 0.1
    w2 = jax.random.normal(k_w2, (Fout, H), dtype=jnp.float32) * 0.1  # Linear(2*Fin -> Fout)
    b2 = jax.random.normal(k_b2, (Fout,), dtype=jnp.float32) * 0.1

    fwd = jax.jit(graphnet_forward)

    ok = True
    # Case 1: module-default small batch (single 128-lane tile, grid=1).
    # Case 2: B=300 -> padded to 384 lanes, TB=128, grid=3: exercises the divisor-based
    #         tile selection, multi-step "parallel" grid and batch-tail padding.
    for B in (64, 300):
        X = jax.random.normal(jax.random.fold_in(k_x, B), (B, N, Fin), dtype=jnp.float32)
        out = jax.block_until_ready(fwd(X, A_hat, w1, b1, w2, b2))
        ref = _reference_forward(X, A_hat, w1, b1, w2, b2)
        ok = ok and (out.shape == (B, N, Fout))
        ok = ok and bool(jnp.allclose(out, ref, atol=1e-4, rtol=1e-4))

    assert ok, "mismatch vs reference"
    print("KERNEL_OK")
</pallas_src>

<mosaic_0001>
module attributes {stable_mosaic.version = 11 : i64} {
  func.func @_graphnet_kernel(%arg0: i32, %arg1: memref<21x21xf32, #tpu.memory_space<vmem>>, %arg2: memref<2x21x128xf32, #tpu.memory_space<vmem>>, %arg3: memref<4x2xf32, #tpu.memory_space<smem>>, %arg4: memref<4xf32, #tpu.memory_space<smem>>, %arg5: memref<2x4xf32, #tpu.memory_space<smem>>, %arg6: memref<2xf32, #tpu.memory_space<smem>>, %arg7: memref<2x21x128xf32, #tpu.memory_space<vmem>>) attributes {dimension_semantics = [#tpu.dimension_semantics<parallel>], iteration_bounds = array<i64: 1>, scalar_prefetch = 0 : i64, scratch_operands = 0 : i64, tpu.core_type = #tpu.core_type<tc>, window_params = [{pipeline_mode = #tpu.pipeline_mode<synchronous>, transform_indices = @transform_0, window_bounds = array<i64: 21, 21>}, {transform_indices = @transform_1, window_bounds = array<i64: 2, 21, 128>}, {transform_indices = @transform_2, window_bounds = array<i64: 4, 2>}, {transform_indices = @transform_3, window_bounds = array<i64: 4>}, {transform_indices = @transform_4, window_bounds = array<i64: 2, 4>}, {transform_indices = @transform_5, window_bounds = array<i64: 2>}, {transform_indices = @transform_6, window_bounds = array<i64: 2, 21, 128>}]} {
    %c0 = arith.constant 0 : index
    %c0_0 = arith.constant 0 : index
    %0 = vector.load %arg1[%c0, %c0_0] : memref<21x21xf32, #tpu.memory_space<vmem>>, vector<21x21xf32>
    %c0_1 = arith.constant 0 : index
    %c0_2 = arith.constant 0 : index
    %c0_3 = arith.constant 0 : index
    %1 = vector.load %arg2[%c0_1, %c0_2, %c0_3] : memref<2x21x128xf32, #tpu.memory_space<vmem>>, vector<1x21x128xf32>
    %2 = vector.shape_cast %1 : vector<1x21x128xf32> to vector<21x128xf32>
    %cst = arith.constant dense<0.000000e+00> : vector<21x128xf32>
    %3 = tpu.matmul %0, %2, %cst {dimension_numbers = #tpu.dot_dimension_numbers<[1], [0], [0], [1], [0, 0, 1, 1], [], []>, precision = #tpu.contract_precision<fp32>} : vector<21x21xf32>, vector<21x128xf32>, vector<21x128xf32> -> vector<21x128xf32>
    %c1 = arith.constant 1 : index
    %c0_4 = arith.constant 0 : index
    %c0_5 = arith.constant 0 : index
    %4 = vector.load %arg2[%c1, %c0_4, %c0_5] : memref<2x21x128xf32, #tpu.memory_space<vmem>>, vector<1x21x128xf32>
    %5 = vector.shape_cast %4 : vector<1x21x128xf32> to vector<21x128xf32>
    %cst_6 = arith.constant dense<0.000000e+00> : vector<21x128xf32>
    %6 = tpu.matmul %0, %5, %cst_6 {dimension_numbers = #tpu.dot_dimension_numbers<[1], [0], [0], [1], [0, 0, 1, 1], [], []>, precision = #tpu.contract_precision<fp32>} : vector<21x21xf32>, vector<21x128xf32>, vector<21x128xf32> -> vector<21x128xf32>
    %c0_7 = arith.constant 0 : index
    %c0_8 = arith.constant 0 : index
    %7 = memref.load %arg3[%c0_7, %c0_8] : memref<4x2xf32, #tpu.memory_space<smem>>
    %8 = vector.broadcast %7 : f32 to vector<21x128xf32>
    %9 = arith.mulf %3, %8 : vector<21x128xf32>
    %c0_9 = arith.constant 0 : index
    %c1_10 = arith.constant 1 : index
    %10 = memref.load %arg3[%c0_9, %c1_10] : memref<4x2xf32, #tpu.memory_space<smem>>
    %11 = vector.broadcast %10 : f32 to vector<21x128xf32>
    %12 = arith.mulf %6, %11 : vector<21x128xf32>
    %13 = arith.addf %9, %12 : vector<21x128xf32>
    %c0_11 = arith.constant 0 : index
    %14 = memref.load %arg4[%c0_11] : memref<4xf32, #tpu.memory_space<smem>>
    %15 = vector.broadcast %14 : f32 to vector<21x128xf32>
    %16 = arith.addf %13, %15 : vector<21x128xf32>
    %cst_12 = arith.constant 0.000000e+00 : f32
    %17 = vector.broadcast %cst_12 : f32 to vector<21x128xf32>
    %18 = arith.maximumf %16, %17 : vector<21x128xf32>
    %c0_13 = arith.constant 0 : index
    %c0_14 = arith.constant 0 : index
    %19 = memref.load %arg5[%c0_13, %c0_14] : memref<2x4xf32, #tpu.memory_space<smem>>
    %20 = vector.broadcast %19 : f32 to vector<21x128xf32>
    %21 = arith.mulf %18, %20 : vector<21x128xf32>
    %c1_15 = arith.constant 1 : index
    %c0_16 = arith.constant 0 : index
    %22 = memref.load %arg5[%c1_15, %c0_16] : memref<2x4xf32, #tpu.memory_space<smem>>
    %23 = vector.broadcast %22 : f32 to vector<21x128xf32>
    %24 = arith.mulf %18, %23 : vector<21x128xf32>
    %c1_17 = arith.constant 1 : index
    %c0_18 = arith.constant 0 : index
    %25 = memref.load %arg3[%c1_17, %c0_18] : memref<4x2xf32, #tpu.memory_space<smem>>
    %26 = vector.broadcast %25 : f32 to vector<21x128xf32>
    %27 = arith.mulf %3, %26 : vector<21x128xf32>
    %c1_19 = arith.constant 1 : index
    %c1_20 = arith.constant 1 : index
    %28 = memref.load %arg3[%c1_19, %c1_20] : memref<4x2xf32, #tpu.memory_space<smem>>
    %29 = vector.broadcast %28 : f32 to vector<21x128xf32>
    %30 = arith.mulf %6, %29 : vector<21x128xf32>
    %31 = arith.addf %27, %30 : vector<21x128xf32>
    %c1_21 = arith.constant 1 : index
    %32 = memref.load %arg4[%c1_21] : memref<4xf32, #tpu.memory_space<smem>>
    %33 = vector.broadcast %32 : f32 to vector<21x128xf32>
    %34 = arith.addf %31, %33 : vector<21x128xf32>
    %cst_22 = arith.constant 0.000000e+00 : f32
    %35 = vector.broadcast %cst_22 : f32 to vector<21x128xf32>
    %36 = arith.maximumf %34, %35 : vector<21x128xf32>
    %c0_23 = arith.constant 0 : index
    %c1_24 = arith.constant 1 : index
    %37 = memref.load %arg5[%c0_23, %c1_24] : memref<2x4xf32, #tpu.memory_space<smem>>
    %38 = vector.broadcast %37 : f32 to vector<21x128xf32>
    %39 = arith.mulf %36, %38 : vector<21x128xf32>
    %40 = arith.addf %21, %39 : vector<21x128xf32>
    %c1_25 = arith.constant 1 : index
    %c1_26 = arith.constant 1 : index
    %41 = memref.load %arg5[%c1_25, %c1_26] : memref<2x4xf32, #tpu.memory_space<smem>>
    %42 = vector.broadcast %41 : f32 to vector<21x128xf32>
    %43 = arith.mulf %36, %42 : vector<21x128xf32>
    %44 = arith.addf %24, %43 : vector<21x128xf32>
    %c2 = arith.constant 2 : index
    %c0_27 = arith.constant 0 : index
    %45 = memref.load %arg3[%c2, %c0_27] : memref<4x2xf32, #tpu.memory_space<smem>>
    %46 = vector.broadcast %45 : f32 to vector<21x128xf32>
    %47 = arith.mulf %3, %46 : vector<21x128xf32>
    %c2_28 = arith.constant 2 : index
    %c1_29 = arith.constant 1 : index
    %48 = memref.load %arg3[%c2_28, %c1_29] : memref<4x2xf32, #tpu.memory_space<smem>>
    %49 = vector.broadcast %48 : f32 to vector<21x128xf32>
    %50 = arith.mulf %6, %49 : vector<21x128xf32>
    %51 = arith.addf %47, %50 : vector<21x128xf32>
    %c2_30 = arith.constant 2 : index
    %52 = memref.load %arg4[%c2_30] : memref<4xf32, #tpu.memory_space<smem>>
    %53 = vector.broadcast %52 : f32 to vector<21x128xf32>
    %54 = arith.addf %51, %53 : vector<21x128xf32>
    %cst_31 = arith.constant 0.000000e+00 : f32
    %55 = vector.broadcast %cst_31 : f32 to vector<21x128xf32>
    %56 = arith.maximumf %54, %55 : vector<21x128xf32>
    %c0_32 = arith.constant 0 : index
    %c2_33 = arith.constant 2 : index
    %57 = memref.load %arg5[%c0_32, %c2_33] : memref<2x4xf32, #tpu.memory_space<smem>>
    %58 = vector.broadcast %57 : f32 to vector<21x128xf32>
    %59 = arith.mulf %56, %58 : vector<21x128xf32>
    %60 = arith.addf %40, %59 : vector<21x128xf32>
    %c1_34 = arith.constant 1 : index
    %c2_35 = arith.constant 2 : index
    %61 = memref.load %arg5[%c1_34, %c2_35] : memref<2x4xf32, #tpu.memory_space<smem>>
    %62 = vector.broadcast %61 : f32 to vector<21x128xf32>
    %63 = arith.mulf %56, %62 : vector<21x128xf32>
    %64 = arith.addf %44, %63 : vector<21x128xf32>
    %c3 = arith.constant 3 : index
    %c0_36 = arith.constant 0 : index
    %65 = memref.load %arg3[%c3, %c0_36] : memref<4x2xf32, #tpu.memory_space<smem>>
    %66 = vector.broadcast %65 : f32 to vector<21x128xf32>
    %67 = arith.mulf %3, %66 : vector<21x128xf32>
    %c3_37 = arith.constant 3 : index
    %c1_38 = arith.constant 1 : index
    %68 = memref.load %arg3[%c3_37, %c1_38] : memref<4x2xf32, #tpu.memory_space<smem>>
    %69 = vector.broadcast %68 : f32 to vector<21x128xf32>
    %70 = arith.mulf %6, %69 : vector<21x128xf32>
    %71 = arith.addf %67, %70 : vector<21x128xf32>
    %c3_39 = arith.constant 3 : index
    %72 = memref.load %arg4[%c3_39] : memref<4xf32, #tpu.memory_space<smem>>
    %73 = vector.broadcast %72 : f32 to vector<21x128xf32>
    %74 = arith.addf %71, %73 : vector<21x128xf32>
    %cst_40 = arith.constant 0.000000e+00 : f32
    %75 = vector.broadcast %cst_40 : f32 to vector<21x128xf32>
    %76 = arith.maximumf %74, %75 : vector<21x128xf32>
    %c0_41 = arith.constant 0 : index
    %c3_42 = arith.constant 3 : index
    %77 = memref.load %arg5[%c0_41, %c3_42] : memref<2x4xf32, #tpu.memory_space<smem>>
    %78 = vector.broadcast %77 : f32 to vector<21x128xf32>
    %79 = arith.mulf %76, %78 : vector<21x128xf32>
    %80 = arith.addf %60, %79 : vector<21x128xf32>
    %c1_43 = arith.constant 1 : index
    %c3_44 = arith.constant 3 : index
    %81 = memref.load %arg5[%c1_43, %c3_44] : memref<2x4xf32, #tpu.memory_space<smem>>
    %82 = vector.broadcast %81 : f32 to vector<21x128xf32>
    %83 = arith.mulf %76, %82 : vector<21x128xf32>
    %84 = arith.addf %64, %83 : vector<21x128xf32>
    %cst_45 = arith.constant dense<0.000000e+00> : vector<21x128xf32>
    %85 = tpu.matmul %0, %80, %cst_45 {dimension_numbers = #tpu.dot_dimension_numbers<[1], [0], [0], [1], [0, 0, 1, 1], [], []>, precision = #tpu.contract_precision<fp32>} : vector<21x21xf32>, vector<21x128xf32>, vector<21x128xf32> -> vector<21x128xf32>
    %c0_46 = arith.constant 0 : index
    %86 = memref.load %arg6[%c0_46] : memref<2xf32, #tpu.memory_space<smem>>
    %87 = vector.broadcast %86 : f32 to vector<21x128xf32>
    %88 = arith.addf %85, %87 : vector<21x128xf32>
    %c0_47 = arith.constant 0 : index
    %c0_48 = arith.constant 0 : index
    %c0_49 = arith.constant 0 : index
    %89 = vector.load %arg7[%c0_47, %c0_48, %c0_49] : memref<2x21x128xf32, #tpu.memory_space<vmem>>, vector<1x21x128xf32>
    %90 = vector.shape_cast %89 : vector<1x21x128xf32> to vector<21x128xf32>
    %91 = vector.shape_cast %88 : vector<21x128xf32> to vector<1x21x128xf32>
    tpu.vector_store %arg7[%c0_47, %c0_48, %c0_49], %91 {strides = array<i32>} : memref<2x21x128xf32, #tpu.memory_space<vmem>>, vector<1x21x128xf32>,
    %cst_50 = arith.constant dense<0.000000e+00> : vector<21x128xf32>
    %92 = tpu.matmul %0, %84, %cst_50 {dimension_numbers = #tpu.dot_dimension_numbers<[1], [0], [0], [1], [0, 0, 1, 1], [], []>, precision = #tpu.contract_precision<fp32>} : vector<21x21xf32>, vector<21x128xf32>, vector<21x128xf32> -> vector<21x128xf32>
    %c1_51 = arith.constant 1 : index
    %93 = memref.load %arg6[%c1_51] : memref<2xf32, #tpu.memory_space<smem>>
    %94 = vector.broadcast %93 : f32 to vector<21x128xf32>
    %95 = arith.addf %92, %94 : vector<21x128xf32>
    %c1_52 = arith.constant 1 : index
    %c0_53 = arith.constant 0 : index
    %c0_54 = arith.constant 0 : index
    %96 = vector.load %arg7[%c1_52, %c0_53, %c0_54] : memref<2x21x128xf32, #tpu.memory_space<vmem>>, vector<1x21x128xf32>
    %97 = vector.shape_cast %96 : vector<1x21x128xf32> to vector<21x128xf32>
    %98 = vector.shape_cast %95 : vector<21x128xf32> to vector<1x21x128xf32>
    tpu.vector_store %arg7[%c1_52, %c0_53, %c0_54], %98 {strides = array<i32>} : memref<2x21x128xf32, #tpu.memory_space<vmem>>, vector<1x21x128xf32>,
    return
  }
  func.func @transform_0(%arg0: i32) -> (i32, i32) {
    %c0_i32 = arith.constant 0 : i32
    %c0_i32_0 = arith.constant 0 : i32
    %c0_i32_1 = arith.constant 0 : i32
    return %c0_i32, %c0_i32_0 : i32, i32
  }
  func.func @transform_1(%arg0: i32) -> (i32, i32, i32) {
    %c0_i32 = arith.constant 0 : i32
    %c0_i32_0 = arith.constant 0 : i32
    %c0_i32_1 = arith.constant 0 : i32
    return %c0_i32, %c0_i32_0, %arg0 : i32, i32, i32
  }
  func.func @transform_2(%arg0: i32) -> (i32, i32) {
    %c0_i32 = arith.constant 0 : i32
    %c0_i32_0 = arith.constant 0 : i32
    %c0_i32_1 = arith.constant 0 : i32
    return %c0_i32, %c0_i32_0 : i32, i32
  }
  func.func @transform_3(%arg0: i32) -> i32 {
    %c0_i32 = arith.constant 0 : i32
    %c0_i32_0 = arith.constant 0 : i32
    return %c0_i32 : i32
  }
  func.func @transform_4(%arg0: i32) -> (i32, i32) {
    %c0_i32 = arith.constant 0 : i32
    %c0_i32_0 = arith.constant 0 : i32
    %c0_i32_1 = arith.constant 0 : i32
    return %c0_i32, %c0_i32_0 : i32, i32
  }
  func.func @transform_5(%arg0: i32) -> i32 {
    %c0_i32 = arith.constant 0 : i32
    %c0_i32_0 = arith.constant 0 : i32
    return %c0_i32 : i32
  }
  func.func @transform_6(%arg0: i32) -> (i32, i32, i32) {
    %c0_i32 = arith.constant 0 : i32
    %c0_i32_0 = arith.constant 0 : i32
    %c0_i32_1 = arith.constant 0 : i32
    return %c0_i32, %c0_i32_0, %arg0 : i32, i32, i32
  }
}

</mosaic_0001>

<bundles_post_ra>
// kernel: graphnet_forward.1
= control target key start
LH: loop header
LB: loop body
LE: loop exit
PB: predicated region body
PF: predicated region fallthrough
CT: control target
= control target key end

     0   :  { %11 = vsyncpa [#allocation3], 0  ;;  %s3902_s0 = inlined_call_operand.vmem [shape: f32[21,21], index: 0, kind: input, shape index: {}]   ;;  %s3903_s1 = inlined_call_operand.vmem [shape: f32[2,21,128], index: 1, kind: input, shape index: {}]   ;;  %s3904_s2 = inlined_call_operand.vmem [shape: f32[4,2], index: 2, kind: input, shape index: {}]   ;;  %s3905_s3 = inlined_call_operand.vmem [shape: f32[4], index: 3, kind: input, shape index: {}]   ;;  %s3906_s4 = inlined_call_operand.vmem [shape: f32[2,4], index: 4, kind: input, shape index: {}]   ;;  %s3907_s5 = inlined_call_operand.vmem [shape: f32[2], index: 5, kind: input, shape index: {}]   ;;  %s3908_s6 = inlined_call_operand.vmem [shape: f32[2,21,128], index: 6, kind: output, shape index: {}]  }
   0x1   :  { %12 = vsyncpa [#allocation5], 0  ;;  %s34_s23 = sshll.u32 %s3905_s3, 4  ;;  %s35_s23 = int_to_ptr.vmem [resolvable:$true] %s34_s23 }
   0x2   :  { %13 = vsyncpa [#allocation8], 0  ;;  %s24_s26 = sshll.u32 %s3904_s2, 4  ;;  %s3030_s27 = scalar_lea.vmem %s35_s23, 16  ;;  %s25_s26 = int_to_ptr.vmem [resolvable:$true] %s24_s26 }
   0x3   :  { %p3031_p0 = scmp.ne.s32.totalorder %s35_s23, %s3030_s27  ;;  %p3035_p1 = scmp.lt.s32.totalorder %s35_s23, %s35_s23 }
   0x4   :  { %p3036_p2 = scmp.lt.s32.totalorder %s3030_s27, %s3030_s27 }
   0x6   :  { %p3037_p3 = por %p3036_p2, %p3035_p1 }
   0x8   :  { %p3038_p4 = pnand %p3037_p3, %p3031_p0 }
   0xa   :  { %3041 = shalt.err (!%p3038_p4)
}
   0xb   :  { %s3084_s28 = smov [#allocation4]   ;;  %s3042_s29 = scalar_lea.vmem %s25_s26, 64 }
   0xc   :  { %37 = dma.vmem_to_smem %s35_s23, 16, %s3084_s28, [#allocation5]  }
   0xd   :  { %p3043_p5 = scmp.ne.s32.totalorder %s25_s26, %s3042_s29  ;;  %p3047_p6 = scmp.lt.s32.totalorder %s25_s26, %s25_s26 }
   0xe   :  { %p3048_p7 = scmp.lt.s32.totalorder %s3042_s29, %s3042_s29 }
  0x10   :  { %p3049_p8 = por %p3048_p7, %p3047_p6 }
  0x12   :  { %p3050_p9 = pnand %p3049_p8, %p3043_p5 }
  0x14   :  { %3053 = shalt.err (!%p3050_p9)
}
  0x15   :  { %s3085_s3 = smov [#allocation2]   ;;  %s44_s7 = sshll.u32 %s3906_s4, 4  ;;  %s45_s7 = int_to_ptr.vmem [resolvable:$true] %s44_s7 }
  0x16   :  { %27 = dma.vmem_to_smem %s25_s26, 64, %s3085_s3, [#allocation3]  }
  0x17   :  { %s54_s10 = sshll.u32 %s3907_s5, 4  ;;  %s3054_s11 = scalar_lea.vmem %s45_s7, 32  ;;  %s55_s10 = int_to_ptr.vmem [resolvable:$true] %s54_s10 }
  0x18   :  { %p3055_p10 = scmp.ne.s32.totalorder %s45_s7, %s3054_s11  ;;  %p3059_p11 = scmp.lt.s32.totalorder %s45_s7, %s45_s7 }
  0x19   :  { %p3060_p12 = scmp.lt.s32.totalorder %s3054_s11, %s3054_s11 }
  0x1b   :  { %p3061_p13 = por %p3060_p12, %p3059_p11 }
  0x1d   :  { %p3062_p0 = pnand %p3061_p13, %p3055_p10 }
  0x1f   :  { %3065 = shalt.err (!%p3062_p0)
}
  0x20   :  { %s3086_s12 = smov [#allocation6]   ;;  %s3066_s13 = scalar_lea.vmem %s55_s10, 16 }
  0x21   :  { %47 = dma.vmem_to_smem %s45_s7, 32, %s3086_s12, [#allocation5]  }
  0x22   :  { %p3067_p1 = scmp.ne.s32.totalorder %s55_s10, %s3066_s13  ;;  %p3071_p2 = scmp.lt.s32.totalorder %s55_s10, %s55_s10 }
  0x23   :  { %p3072_p3 = scmp.lt.s32.totalorder %s3066_s13, %s3066_s13 }
  0x25   :  { %p3073_p4 = por %p3072_p3, %p3071_p2 }
  0x27   :  { %p3074_p5 = pnand %p3073_p4, %p3067_p1 }
  0x29   :  { %3077 = shalt.err (!%p3074_p5)
}
  0x2a   :  { %s3087_s4 = smov [#allocation7]  }
  0x2b   :  { %57 = dma.vmem_to_smem %s55_s10, 16, %s3087_s4, [#allocation8]  }
  0x2c   :  { %3078 = dma.done.wait [#allocation3], 64  }
  0x2d   :  { %3079 = vsyncadd [#allocation3], 4294967232 }
  0x2e   :  { %3080 = dma.done.wait [#allocation5], 48  }
  0x2f   :  { %3081 = vsyncadd [#allocation5], 4294967248 }
  0x30   :  { %3082 = dma.done.wait [#allocation8], 16  }
  0x31   :  { %3083 = vsyncadd [#allocation8], 4294967280 }
  0x32   :  { %70 = sfence }
  0x33   :  { %v76_v0 = vld [vmem:[%s3903_s1 + $0x10] sm:$0x1f]  ;;  %vm87_vm0 = vcmask 1044480   ;;  %v75_v1 = vld [vmem:[%s3903_s1 + $0x8] sm:$0xff]  ;;  %v74_v2 = vld [vmem:[%s3903_s1] sm:$0xff]  ;;  %v3088_v3 = vmov 0.0  }
  0x34   :  { %2664 = vmatprep.subr.mxu0 %v3088_v3  ;;  %v89_v4 = vsel %vm87_vm0, %v76_v0, 0  ;;  %v3148_v5 = vand.u32 4294901760, %v75_v1  ;;  %v3150_v6 = vand.u32 4294901760, %v74_v2  ;;  %2679 = vmatprep.subr.mxu1 %v3088_v3  ;;  %v71_v7 = vld [vmem:[%s3902_s0] sm:$0xff]  ;;  %v72_v8 = vld [vmem:[%s3902_s0 + $0x8] sm:$0xff]  ;;  %vm3089_vm1 = vmmov 0  }
  0x35   :  { %v3159_v9 = vand.u32 4294901760, %v89_v4  ;;  %2670 = vmatprep.mubr.msk.f32.mxu0 %vm3089_vm1, %v3088_v3  ;;  %vm77_vm2 = vcmask 171008   ;;  %2685 = vmatprep.mubr.msk.f32.mxu1 %vm3089_vm1, %v3088_v3  ;;  %v73_v10 = vld [vmem:[%s3902_s0 + $0x10] sm:$0x1f]  ;;  %v2498_v41 = vld [vmem:[%s3903_s1 + $0x28] sm:$0x1f] }
  0x36   :  { %v79_v11 = vsel %vm77_vm2, %v71_v7, 0  ;;  %v3169_v12 = vsub.f32 %v75_v1, %v3148_v5  ;;  %v82_v13 = vsel %vm77_vm2, %v72_v8, 0  ;;  %v3172_v14 = vsub.f32 %v74_v2, %v3150_v6  ;;  %v2497_v43 = vld [vmem:[%s3903_s1 + $0x20] sm:$0xff]  ;;  %v2496_v45 = vld [vmem:[%s3903_s1 + $0x18] sm:$0xff]  ;;  %s3464_s1 = sld [smem:[#allocation2]] }
  0x37   :  { %2665 = vmatpush3.msra.mxu0 %v3159_v9  ;;  %v3175_v15 = vand.u32 4294901760, %v79_v11  ;;  %v3178_v16 = vsub.f32 %v89_v4, %v3159_v9  ;;  %v3180_v17 = vand.u32 4294901760, %v82_v13  ;;  %v85_v18 = vsel %vm77_vm2, %v73_v10, 0  ;;  %s3466_s3 = sld [smem:[#allocation2 + $0x80]] }
  0x38   :  { %2666 = vmatprep.subr.mxu0 %v3088_v3  ;;  %v225_v19 = vand.u32 4294901760, %v3169_v12  ;;  %v232_v20 = vand.u32 4294901760, %v3172_v14  ;;  %v3185_v21 = vand.u32 4294901760, %v85_v18  ;;  %v654_v42 = vsel %vm87_vm0, %v2498_v41, 0  ;;  %s3468_s2 = sld [smem:[#allocation2 + $0x100]] }
  0x39   :  { %2667 = vmatpush3.msra.mxu0 %v3148_v5  ;;  %v3189_v22 = vsub.f32 %v79_v11, %v3175_v15  ;;  %v218_v23 = vand.u32 4294901760, %v3178_v16  ;;  %v3193_v24 = vsub.f32 %v82_v13, %v3180_v17  ;;  %v3271_v44 = vand.u32 4294901760, %v654_v42  ;;  %s3470_s30 = sld [smem:[#allocation2 + $0x180]] }
  0x3a   :  { %2668 = vmatprep.subr.mxu0 %v3088_v3  ;;  %v226_v25 = vsub.f32 %v3169_v12, %v225_v19  ;;  %v3200_v26 = vsub.f32 %v85_v18, %v3185_v21  ;;  %v233_v30 = vsub.f32 %v3172_v14, %v232_v20  ;;  %v3280_v46 = vand.u32 4294901760, %v2497_v43  ;;  %s3474_s7 = sld [smem:[#allocation2 + $0x1]] }
  0x3b   :  { %2669 = vmatpush3.msra.mxu0 %v3150_v6  ;;  %v3204_v27 = vand.u32 4294901760, %v3189_v22  ;;  %v219_v28 = vsub.f32 %v3178_v16, %v218_v23  ;;  %v3208_v29 = vand.u32 4294901760, %v3193_v24  ;;  %v3289_v47 = vsub.f32 %v654_v42, %v3271_v44  ;;  %s3476_s8 = sld [smem:[#allocation2 + $0x81]] }
  0x3c   :  { %v227_v31 = vand.u32 4294901760, %v226_v25  ;;  %2694 = vmatprep.subr.mxu0 %v3088_v3  ;;  %v3219_v35 = vand.u32 4294901760, %v3200_v26  ;;  %v234_v37 = vand.u32 4294901760, %v233_v30  ;;  %v3291_v48 = vand.u32 4294901760, %v2496_v45  ;;  %s3480_s9 = sld [smem:[#allocation2 + $0x101]] }
  0x3d   :  { %v162_v32 = vsub.f32 %v3189_v22, %v3204_v27  ;;  %v220_v33 = vand.u32 4294901760, %v219_v28  ;;  %v172_v34 = vsub.f32 %v3193_v24, %v3208_v29  ;;  %v3299_v49 = vsub.f32 %v2497_v43, %v3280_v46  ;;  %s3482_s10 = sld [smem:[#allocation2 + $0x181]] }
  0x3e   :  { %v182_v39 = vsub.f32 %v3200_v26, %v3219_v35  ;;  %v3308_v50 = vsub.f32 %v2496_v45, %v3291_v48  ;;  %v783_v51 = vand.u32 4294901760, %v3289_v47  ;;  %s3484_s11 = sld [smem:[#allocation4]] }
  0x3f   :  { %v3221_v36 = vand.u32 4294901760, %v162_v32  ;;  %2680 = vmatpush3.msra.mxu1 %v220_v33  ;;  %v3225_v38 = vand.u32 4294901760, %v172_v34  ;;  %v790_v52 = vand.u32 4294901760, %v3299_v49  ;;  %s3486_s12 = sld [smem:[#allocation4 + $0x1]] }
  0x40   :  { %2681 = vmatprep.subr.mxu1 %v3088_v3  ;;  %v3236_v40 = vand.u32 4294901760, %v182_v39  ;;  %v784_v53 = vsub.f32 %v3289_v47, %v783_v51  ;;  %v797_v54 = vand.u32 4294901760, %v3308_v50  ;;  %s3488_s13 = sld [smem:[#allocation4 + $0x2]] }
  0x41   :  { %2671 = vmatmul.mubr.f32.vlgmr.msra.gmra.mxu0 %v3221_v36  ;;  %2682 = vmatpush3.msra.mxu1 %v227_v31  ;;  %v791_v55 = vsub.f32 %v3299_v49, %v790_v52  ;;  %s3490_s4 = sld [smem:[#allocation4 + $0x3]] }
  0x42   :  { %2673 = vmatprep.mubr.msk.f32.mxu0 %vm3089_vm1, %v3088_v3  ;;  %2683 = vmatprep.subr.mxu1 %v3088_v3  ;;  %v785_v56 = vand.u32 4294901760, %v784_v53  ;;  %v798_v57 = vsub.f32 %v3308_v50, %v797_v54  ;;  %s3492_s5 = sld [smem:[#allocation6]] }
  0x43   :  { %2684 = vmatpush3.msra.mxu1 %v234_v37  ;;  %2695 = vmatpush3.msra.mxu0 %v3178_v16  ;;  %v792_v58 = vand.u32 4294901760, %v791_v55  ;;  %s3495_s14 = sld [smem:[#allocation6 + $0x1]] }
  0x44   :  { %2686 = vmatmul.mubr.f32.vlgmr.msra.gmra.mxu1 %v3175_v15  ;;  %2696 = vmatprep.subr.mxu0 %v3088_v3  ;;  %v799_v59 = vand.u32 4294901760, %v798_v57  ;;  %s3499_s15 = sld [smem:[#allocation6 + $0x2]] }
  0x45   :  { %2674 = vmatmul.mubr.f32.gmra.mxu0 %v3225_v38  ;;  %2688 = vmatprep.mubr.msk.f32.mxu1 %vm3089_vm1, %v3088_v3  ;;  %s3504_s16 = sld [smem:[#allocation6 + $0x3]] }
  0x46   :  { %2676 = vmatprep.mubr.msk.f32.mxu0 %vm3089_vm1, %v3088_v3  ;;  %2697 = vmatpush3.msra.mxu0 %v3169_v12  ;;  %s2500_s17 = sld [smem:[#allocation6 + $0x80]] }
  0x47   :  { %2698 = vmatprep.subr.mxu0 %v3088_v3  ;;  %2709 = vmatprep.subr.mxu1 %v3088_v3  ;;  %s2505_s18 = sld [smem:[#allocation6 + $0x81]] }
  0x48   :  { %2689 = vmatmul.mubr.f32.gmra.mxu1 %v3180_v17  ;;  %2699 = vmatpush3.msra.mxu0 %v3172_v14  ;;  %s2510_s19 = sld [smem:[#allocation6 + $0x82]] }
  0x49   :  { %2677 = vmatmul.mubr.f32.gmra.mxu0 %v3236_v40  ;;  %2691 = vmatprep.mubr.msk.f32.mxu1 %vm3089_vm1, %v3088_v3  ;;  %s2515_s20 = sld [smem:[#allocation6 + $0x83]] }
  0x4a   :  { %2700 = vmatprep.mubr.msk.f32.mxu0 %vm3089_vm1, %v3088_v3  ;;  %2710 = vmatpush3.msra.mxu1 %v3159_v9  ;;  %s1356_s21 = sld [smem:[#allocation7]] }
  0x4b   :  { %2711 = vmatprep.subr.mxu1 %v3088_v3  ;;  %2724 = vmatprep.subr.mxu0 %v3088_v3  ;;  %s2516_s27 = sld [smem:[#allocation7 + $0x1]] }
  0x4c   :  { %2692 = vmatmul.mubr.f32.gmra.mxu1 %v3185_v21 }
  0x4d   :  { %2701 = vmatmul.mubr.f32.vlgmr.msra.gmra.mxu0 %v3189_v22  ;;  %2712 = vmatpush3.msra.mxu1 %v3148_v5 }
  0x4e   :  { %2703 = vmatprep.mubr.msk.f32.mxu0 %vm3089_vm1, %v3088_v3  ;;  %2713 = vmatprep.subr.mxu1 %v3088_v3 }
  0x4f   :  { %2714 = vmatpush3.msra.mxu1 %v3150_v6  ;;  %2715 = vmatprep.mubr.msk.f32.mxu1 %vm3089_vm1, %v3088_v3 }
  0x50   :  { %2716 = vmatmul.mubr.f32.vlgmr.msra.gmra.mxu1 %v3204_v27  ;;  %2725 = vmatpush3.msra.mxu0 %v218_v23 }
  0x51   :  { %2704 = vmatmul.mubr.f32.gmra.mxu0 %v3193_v24  ;;  %2718 = vmatprep.mubr.msk.f32.mxu1 %vm3089_vm1, %v3088_v3 }
  0x52   :  { %2706 = vmatprep.mubr.msk.f32.mxu0 %vm3089_vm1, %v3088_v3  ;;  %2726 = vmatprep.subr.mxu0 %v3088_v3 }
  0x53   :  { %2727 = vmatpush3.msra.mxu0 %v225_v19  ;;  %2739 = vmatprep.subr.mxu1 %v3088_v3 }
  0x54   :  { %2719 = vmatmul.mubr.f32.gmra.mxu1 %v3208_v29  ;;  %2728 = vmatprep.subr.mxu0 %v3088_v3 }
  0x55   :  { %2707 = vmatmul.mubr.f32.gmra.mxu0 %v3200_v26  ;;  %2721 = vmatprep.mubr.msk.f32.mxu1 %vm3089_vm1, %v3088_v3 }
  0x56   :  { %2729 = vmatpush3.msra.mxu0 %v232_v20  ;;  %2730 = vmatprep.mubr.msk.f32.mxu0 %vm3089_vm1, %v3088_v3 }
  0x57   :  { %2740 = vmatpush3.msra.mxu1 %v3159_v9  ;;  %2754 = vmatprep.subr.mxu0 %v3088_v3 }
  0x58   :  { %2722 = vmatmul.mubr.f32.gmra.mxu1 %v3219_v35  ;;  %2741 = vmatprep.subr.mxu1 %v3088_v3 }
  0x59   :  { %2731 = vmatmul.mubr.f32.vlgmr.msra.gmra.mxu0 %v3175_v15  ;;  %2742 = vmatpush3.msra.mxu1 %v3148_v5 }
  0x5a   :  { %2733 = vmatprep.mubr.msk.f32.mxu0 %vm3089_vm1, %v3088_v3  ;;  %2743 = vmatprep.subr.mxu1 %v3088_v3 }
  0x5b   :  { %2744 = vmatpush3.msra.mxu1 %v3150_v6  ;;  %2745 = vmatprep.mubr.msk.f32.mxu1 %vm3089_vm1, %v3088_v3 }
  0x5c   :  { %2746 = vmatmul.mubr.f32.vlgmr.msra.gmra.mxu1 %v3175_v15  ;;  %2755 = vmatpush3.msra.mxu0 %v3271_v44 }
  0x5d   :  { %2734 = vmatmul.mubr.f32.gmra.mxu0 %v3180_v17  ;;  %2748 = vmatprep.mubr.msk.f32.mxu1 %vm3089_vm1, %v3088_v3 }
  0x5e   :  { %2736 = vmatprep.mubr.msk.f32.mxu0 %vm3089_vm1, %v3088_v3  ;;  %2756 = vmatprep.subr.mxu0 %v3088_v3 }
  0x5f   :  { %2757 = vmatpush3.msra.mxu0 %v3280_v46  ;;  %2769 = vmatprep.subr.mxu1 %v3088_v3 }
  0x60   :  { %2749 = vmatmul.mubr.f32.gmra.mxu1 %v3180_v17  ;;  %2758 = vmatprep.subr.mxu0 %v3088_v3 }
  0x61   :  { %2737 = vmatmul.mubr.f32.gmra.mxu0 %v3185_v21  ;;  %2751 = vmatprep.mubr.msk.f32.mxu1 %vm3089_vm1, %v3088_v3 }
  0x62   :  { %2759 = vmatpush3.msra.mxu0 %v3291_v48  ;;  %2760 = vmatprep.mubr.msk.f32.mxu0 %vm3089_vm1, %v3088_v3 }
  0x63   :  { %2770 = vmatpush3.msra.mxu1 %v785_v56  ;;  %2784 = vmatprep.subr.mxu0 %v3088_v3 }
  0x64   :  { %2752 = vmatmul.mubr.f32.gmra.mxu1 %v3185_v21  ;;  %2771 = vmatprep.subr.mxu1 %v3088_v3 }
  0x65   :  { %2761 = vmatmul.mubr.f32.vlgmr.msra.gmra.mxu0 %v3221_v36  ;;  %2772 = vmatpush3.msra.mxu1 %v792_v58 }
  0x66   :  { %2763 = vmatprep.mubr.msk.f32.mxu0 %vm3089_vm1, %v3088_v3  ;;  %2773 = vmatprep.subr.mxu1 %v3088_v3 }
  0x67   :  { %2774 = vmatpush3.msra.mxu1 %v799_v59  ;;  %2775 = vmatprep.mubr.msk.f32.mxu1 %vm3089_vm1, %v3088_v3 }
  0x68   :  { %2776 = vmatmul.mubr.f32.vlgmr.msra.gmra.mxu1 %v3175_v15  ;;  %2785 = vmatpush3.msra.mxu0 %v3289_v47 }
  0x69   :  { %2764 = vmatmul.mubr.f32.gmra.mxu0 %v3225_v38  ;;  %2778 = vmatprep.mubr.msk.f32.mxu1 %vm3089_vm1, %v3088_v3 }
  0x6a   :  { %2766 = vmatprep.mubr.msk.f32.mxu0 %vm3089_vm1, %v3088_v3  ;;  %2786 = vmatprep.subr.mxu0 %v3088_v3 }
  0x6b   :  { %2787 = vmatpush3.msra.mxu0 %v3299_v49  ;;  %2799 = vmatprep.subr.mxu1 %v3088_v3 }
  0x6c   :  { %2779 = vmatmul.mubr.f32.gmra.mxu1 %v3180_v17  ;;  %2788 = vmatprep.subr.mxu0 %v3088_v3 }
  0x6d   :  { %2767 = vmatmul.mubr.f32.gmra.mxu0 %v3236_v40  ;;  %2781 = vmatprep.mubr.msk.f32.mxu1 %vm3089_vm1, %v3088_v3 }
  0x6e   :  { %2789 = vmatpush3.msra.mxu0 %v3308_v50  ;;  %2790 = vmatprep.mubr.msk.f32.mxu0 %vm3089_vm1, %v3088_v3 }
  0x6f   :  { %2800 = vmatpush3.msra.mxu1 %v3271_v44  ;;  %2814 = vmatprep.subr.mxu0 %v3088_v3 }
  0x70   :  { %2782 = vmatmul.mubr.f32.gmra.mxu1 %v3185_v21  ;;  %2801 = vmatprep.subr.mxu1 %v3088_v3 }
  0x71   :  { %2791 = vmatmul.mubr.f32.vlgmr.msra.gmra.mxu0 %v3189_v22  ;;  %2802 = vmatpush3.msra.mxu1 %v3280_v46 }
  0x72   :  { %2793 = vmatprep.mubr.msk.f32.mxu0 %vm3089_vm1, %v3088_v3  ;;  %2803 = vmatprep.subr.mxu1 %v3088_v3 }
  0x73   :  { %2804 = vmatpush3.msra.mxu1 %v3291_v48  ;;  %2805 = vmatprep.mubr.msk.f32.mxu1 %vm3089_vm1, %v3088_v3 }
  0x74   :  { %2806 = vmatmul.mubr.f32.vlgmr.msra.gmra.mxu1 %v3204_v27  ;;  %2815 = vmatpush3.msra.mxu0 %v783_v51 }
  0x75   :  { %2794 = vmatmul.mubr.f32.gmra.mxu0 %v3193_v24  ;;  %2808 = vmatprep.mubr.msk.f32.mxu1 %vm3089_vm1, %v3088_v3 }
  0x76   :  { %2796 = vmatprep.mubr.msk.f32.mxu0 %vm3089_vm1, %v3088_v3  ;;  %2816 = vmatprep.subr.mxu0 %v3088_v3 }
  0x77   :  { %2817 = vmatpush3.msra.mxu0 %v790_v52  ;;  %2829 = vmatprep.subr.mxu1 %v3088_v3 }
  0x78   :  { %2809 = vmatmul.mubr.f32.gmra.mxu1 %v3208_v29  ;;  %2818 = vmatprep.subr.mxu0 %v3088_v3 }
  0x79   :  { %2797 = vmatmul.mubr.f32.gmra.mxu0 %v3200_v26  ;;  %2811 = vmatprep.mubr.msk.f32.mxu1 %vm3089_vm1, %v3088_v3 }
  0x7a   :  { %2819 = vmatpush3.msra.mxu0 %v797_v54  ;;  %2820 = vmatprep.mubr.msk.f32.mxu0 %vm3089_vm1, %v3088_v3 }
  0x7b   :  { %2830 = vmatpush3.msra.mxu1 %v3271_v44  ;;  %2844 = vmatprep.subr.mxu0 %v3088_v3 }
  0x7c   :  { %2812 = vmatmul.mubr.f32.gmra.mxu1 %v3219_v35  ;;  %2831 = vmatprep.subr.mxu1 %v3088_v3 }
  0x7d   :  { %2821 = vmatmul.mubr.f32.vlgmr.msra.gmra.mxu0 %v3175_v15  ;;  %2832 = vmatpush3.msra.mxu1 %v3280_v46 }
  0x7e   :  { %2823 = vmatprep.mubr.msk.f32.mxu0 %vm3089_vm1, %v3088_v3  ;;  %2833 = vmatprep.subr.mxu1 %v3088_v3 }
  0x7f   :  { %2834 = vmatpush3.msra.mxu1 %v3291_v48  ;;  %2835 = vmatprep.mubr.msk.f32.mxu1 %vm3089_vm1, %v3088_v3 }
  0x80   :  { %2836 = vmatmul.mubr.f32.vlgmr.msra.gmra.mxu1 %v3175_v15  ;;  %2859 = vmatprep.subr.mxu1 %v3088_v3 }
  0x81   :  { %2824 = vmatmul.mubr.f32.gmra.mxu0 %v3180_v17  ;;  %2838 = vmatprep.mubr.msk.f32.mxu1 %vm3089_vm1, %v3088_v3 }
  0x82   :  { %2826 = vmatprep.mubr.msk.f32.mxu0 %vm3089_vm1, %v3088_v3 }
  0x84   :  { %2839 = vmatmul.mubr.f32.gmra.mxu1 %v3180_v17 }
  0x85   :  { %2827 = vmatmul.mubr.f32.gmra.mxu0 %v3185_v21  ;;  %2841 = vmatprep.mubr.msk.f32.mxu1 %vm3089_vm1, %v3088_v3 }
  0x86   :  { %2850 = vmatprep.mubr.msk.f32.mxu0 %vm3089_vm1, %v3088_v3 }
  0x88   :  { %2842 = vmatmul.mubr.f32.gmra.mxu1 %v3185_v21 }
  0x89   :  { %2865 = vmatprep.mubr.msk.f32.mxu1 %vm3089_vm1, %v3088_v3 }
 0x101   :  { %v165_v60 = vpop.f32.mrf.mxu0 }
 0x103   :  { %v2672_v61 = vpop.f32.mrf.mxu0 }
 0x104   :  { %v271_v62 = vpop.f32.mrf.mxu1 }
 0x105   :  { %v3438_v63 = vpop.f32.mrf.mxu0  ;;  %v3440_v0 = vadd.f32 %v271_v62, %v165_v60 }
 0x106   :  { %v2687_v1 = vpop.f32.mrf.mxu1 }
 0x107   :  { %v2675_v2 = vpop.f32.mrf.mxu0 }
 0x108   :  { %v3442_v4 = vpop.f32.mrf.mxu1 }
 0x109   :  { %v3444_v5 = vpop.f32.mrf.mxu0 }
 0x10a   :  { %v2690_v6 = vpop.f32.mrf.mxu1 }
 0x10b   :  { %v2678_v7 = vpop.f32.mrf.mxu0  ;;  %v278_v6 = vadd.f32 %v3442_v4, %v3438_v63  ;;  %v3513_v63 = vstv %s3470_s30 }
 0x10c   :  { %v3446_v8 = vpop.f32.mrf.mxu1 }
 0x10d   :  { %v361_v9 = vpop.f32.mrf.mxu0 }
 0x10e   :  { %v2693_v10 = vpop.f32.mrf.mxu1  ;;  %v362_v1 = vadd.f32 %v361_v9, %v3440_v0  ;;  %v3507_v9 = vstv %s3466_s3 }
 0x10f   :  { %v2702_v11 = vpop.f32.mrf.mxu0 }
 0x110   :  { %v451_v12 = vpop.f32.mrf.mxu1  ;;  %v3502_v11 = vstv %s3464_s1 }
 0x111   :  { %v368_v13 = vpop.f32.mrf.mxu0  ;;  %v452_v10 = vadd.f32 %v451_v12, %v362_v1  ;;  %v284_v12 = vadd.f32 %v3446_v8, %v3444_v5 }
 0x112   :  { %v2717_v14 = vpop.f32.mrf.mxu1  ;;  %v369_v0 = vadd.f32 %v368_v13, %v278_v6  ;;  %v3559_v6 = vstv %s3504_s16 }
 0x113   :  { %v2705_v16 = vpop.f32.mrf.mxu0 }
 0x114   :  { %v3448_v18 = vpop.f32.mrf.mxu1 }
 0x115   :  { %v3450_v19 = vpop.f32.mrf.mxu0  ;;  %v460_v13 = vadd.f32 %v3448_v18, %v369_v0 }
 0x116   :  { %v2720_v20 = vpop.f32.mrf.mxu1  ;;  %v376_v5 = vadd.f32 %v3450_v19, %v284_v12 }
 0x117   :  { %v2708_v23 = vpop.f32.mrf.mxu0  ;;  %v3510_v20 = vstv %s3468_s2 }
 0x118   :  { %v3452_v25 = vpop.f32.mrf.mxu1 }
 0x119   :  { %v547_v28 = vpop.f32.mrf.mxu0 }
 0x11a   :  { %v2723_v30 = vpop.f32.mrf.mxu1  ;;  %v548_v23 = vadd.f32 %v547_v28, %v452_v10 }
 0x11b   :  { %v2732_v31 = vpop.f32.mrf.mxu0 }
 0x11c   :  { %v3454_v32 = vpop.f32.mrf.mxu1 }
 0x11d   :  { %v3456_v33 = vpop.f32.mrf.mxu0  ;;  %v634_v8 = vadd.f32 %v3454_v32, %v548_v23  ;;  %v3544_v32 = vstv %s3492_s5 }
 0x11e   :  { %v2747_v34 = vpop.f32.mrf.mxu1  ;;  %v554_v18 = vadd.f32 %v3456_v33, %v460_v13  ;;  %v3551_v33 = vstv %s3495_s14 }
 0x11f   :  { %v2735_v37 = vpop.f32.mrf.mxu0  ;;  %v3518_v34 = vstv %s3474_s7  ;;  %v1247_v10 = vmul.f32 %v3507_v9, %v634_v8 }
 0x120   :  { %v3458_v39 = vpop.f32.mrf.mxu1 }
 0x121   :  { %v3460_v41 = vpop.f32.mrf.mxu0 }
 0x122   :  { %v2750_v42 = vpop.f32.mrf.mxu1 }
 0x123   :  { %v2738_v43 = vpop.f32.mrf.mxu0  ;;  %v3522_v42 = vstv %s3476_s8 }
 0x124   :  { %v3462_v44 = vpop.f32.mrf.mxu1  ;;  %v3525_v43 = vstv %s3480_s9 }
 0x125   :  { %v730_v45 = vpop.f32.mrf.mxu0 }
 0x126   :  { %v2753_v46 = vpop.f32.mrf.mxu1 }
 0x127   :  { %v2762_v47 = vpop.f32.mrf.mxu0 }
 0x128   :  { %v836_v48 = vpop.f32.mrf.mxu1  ;;  %v3533_v47 = vstv %s3484_s11 }
 0x129   :  { %v740_v49 = vpop.f32.mrf.mxu0  ;;  %v837_v14 = vadd.f32 %v836_v48, %v730_v45  ;;  %v3528_v45 = vstv %s3482_s10 }
 0x12a   :  { %v2777_v50 = vpop.f32.mrf.mxu1 }
 0x12b   :  { %v2765_v51 = vpop.f32.mrf.mxu0 }
 0x12c   :  { %v842_v52 = vpop.f32.mrf.mxu1  ;;  %v3537_v51 = vstv %s3486_s12 }
 0x12d   :  { %v3472_v53 = vpop.f32.mrf.mxu0  ;;  %v843_v48 = vadd.f32 %v842_v52, %v740_v49  ;;  %v3554_v49 = vstv %s3499_s15  ;;  %v1216_v52 = vmul.f32 %v3502_v11, %v634_v8 }
 0x12e   :  { %v2780_v54 = vpop.f32.mrf.mxu1 }
 0x12f   :  { %v2768_v55 = vpop.f32.mrf.mxu0  ;;  %v3540_v54 = vstv %s3488_s13 }
 0x130   :  { %v3478_v56 = vpop.f32.mrf.mxu1  ;;  %v468_v55 = vadd.f32 %v3452_v25, %v376_v5 }
 0x131   :  { %v926_v57 = vpop.f32.mrf.mxu0 }
 0x132   :  { %v2783_v58 = vpop.f32.mrf.mxu1  ;;  %v927_v30 = vadd.f32 %v926_v57, %v837_v14  ;;  %v560_v1 = vadd.f32 %v3460_v41, %v468_v55  ;;  %v1284_v14 = vmul.f32 %v3510_v20, %v634_v8 }
 0x133   :  { %v2792_v59 = vpop.f32.mrf.mxu0  ;;  %v3547_v58 = vstv %s3490_s4 }
 0x134   :  { %v1016_v60 = vpop.f32.mrf.mxu1  ;;  %v640_v59 = vadd.f32 %v3458_v39, %v554_v18  ;;  %v849_v39 = vadd.f32 %v3478_v56, %v3472_v53 }
 0x135   :  { %v933_v61 = vpop.f32.mrf.mxu0  ;;  %v1017_v28 = vadd.f32 %v1016_v60, %v927_v30 }
 0x136   :  { %v2807_v62 = vpop.f32.mrf.mxu1  ;;  %v934_v60 = vadd.f32 %v933_v61, %v843_v48  ;;  %v1217_v13 = vmul.f32 %v3502_v11, %v640_v59  ;;  %v1248_v48 = vmul.f32 %v3507_v9, %v640_v59  ;;  %v1322_v55 = vmul.f32 %v3513_v63, %v640_v59 }
 0x137   :  { %v2795_v2 = vpop.f32.mrf.mxu0 }
 0x138   :  { %v1024_v7 = vpop.f32.mrf.mxu1 }
 0x139   :  { %v940_v16 = vpop.f32.mrf.mxu0  ;;  %v1025_v61 = vadd.f32 %v1024_v7, %v934_v60 }
 0x13a   :  { %v2810_v4 = vpop.f32.mrf.mxu1  ;;  %v941_v5 = vadd.f32 %v940_v16, %v849_v39 }
 0x13b   :  { %v2798_v31 = vpop.f32.mrf.mxu0  ;;  %v646_v4 = vadd.f32 %v3462_v44, %v560_v1 }
 0x13c   :  { %v1032_v37 = vpop.f32.mrf.mxu1  ;;  %v1321_v31 = vmul.f32 %v3513_v63, %v634_v8 }
 0x13d   :  { %v1112_v46 = vpop.f32.mrf.mxu0  ;;  %v1218_v8 = vmul.f32 %v3502_v11, %v646_v4  ;;  %v1033_v60 = vadd.f32 %v1032_v37, %v941_v5 }
 0x13e   :  { %v2813_v50 = vpop.f32.mrf.mxu1  ;;  %v1113_v19 = vadd.f32 %v1112_v46, %v1017_v28 }
 0x13f   :  { %v2822_v57 = vpop.f32.mrf.mxu0  ;;  %v1285_v50 = vmul.f32 %v3510_v20, %v640_v59 }
 0x140   :  { %v1198_v62 = vpop.f32.mrf.mxu1 }
 0x141   :  { %v1118_v2 = vpop.f32.mrf.mxu0  ;;  %v1199_v25 = vadd.f32 %v1198_v62, %v1113_v19 }
 0x142   :  { %v2837_v0 = vpop.f32.mrf.mxu1  ;;  %v1119_v28 = vadd.f32 %v1118_v2, %v1025_v61 }
 0x143   :  { %v1221_v12 = vmul.f32 %v3518_v34, %v1199_v25  ;;  %v1252_v23 = vmul.f32 %v3522_v42, %v1199_v25  ;;  %v1289_v41 = vmul.f32 %v3525_v43, %v1199_v25  ;;  %v2825_v30 = vpop.f32.mrf.mxu0  ;;  %v1326_v7 = vmul.f32 %v3528_v45, %v1199_v25 }
 0x144   :  { %v1204_v46 = vpop.f32.mrf.mxu1  ;;  %v1249_v30 = vmul.f32 %v3507_v9, %v646_v4 }
 0x145   :  { %v1224_v18 = vadd.f32 %v1221_v12, %v1216_v52  ;;  %v1255_v53 = vadd.f32 %v1252_v23, %v1247_v10  ;;  %v1292_v56 = vadd.f32 %v1289_v41, %v1284_v14  ;;  %v1124_v44 = vpop.f32.mrf.mxu0  ;;  %v1205_v19 = vadd.f32 %v1204_v46, %v1119_v28 }
 0x146   :  { %v2840_v57 = vpop.f32.mrf.mxu1  ;;  %v1329_v39 = vadd.f32 %v1326_v7, %v1321_v31  ;;  %v1125_v46 = vadd.f32 %v1124_v44, %v1033_v60 }
 0x147   :  { %v3577_v16 = vadd.f32 %v3533_v47, %v1224_v18  ;;  %v3580_v62 = vadd.f32 %v3537_v51, %v1255_v53  ;;  %v2828_v52 = vpop.f32.mrf.mxu0  ;;  %v1222_v1 = vmul.f32 %v3518_v34, %v1205_v19  ;;  %v1253_v2 = vmul.f32 %v3522_v42, %v1205_v19 }
 0x148   :  { %v1290_v25 = vmul.f32 %v3525_v43, %v1205_v19  ;;  %v1327_v59 = vmul.f32 %v3528_v45, %v1205_v19  ;;  %v1210_v10 = vpop.f32.mrf.mxu1  ;;  %v3589_v37 = vadd.f32 %v3540_v54, %v1292_v56  ;;  %v1286_v53 = vmul.f32 %v3510_v20, %v646_v4 }
 0x149   :  { %v1232_v14 = vmax.f32 %v3577_v16, 0.0  ;;  %v1263_v11 = vmax.f32 %v3580_v62, 0.0  ;;  %v1225_v61 = vadd.f32 %v1222_v1, %v1217_v13  ;;  %v1256_v0 = vadd.f32 %v1253_v2, %v1248_v48 }
 0x14a   :  { %v1293_v12 = vadd.f32 %v1290_v25, %v1285_v50  ;;  %v1330_v23 = vadd.f32 %v1327_v59, %v1322_v55  ;;  %v2843_v41 = vpop.f32.mrf.mxu1  ;;  %v1323_v56 = vmul.f32 %v3513_v63, %v646_v4  ;;  %v3613_v7 = vadd.f32 %v3547_v58, %v1329_v39 }
 0x14b   :  { %v1237_v5 = vmul.f32 %v3544_v32, %v1232_v14  ;;  %v1268_v28 = vmul.f32 %v3551_v33, %v1263_v11  ;;  %v3599_v18 = vadd.f32 %v3533_v47, %v1225_v61  ;;  %v3602_v31 = vadd.f32 %v3537_v51, %v1256_v0 }
 0x14c   :  { %v3605_v13 = vadd.f32 %v3540_v54, %v1293_v12  ;;  %v3608_v9 = vadd.f32 %v3547_v58, %v1330_v23  ;;  %v1211_v44 = vadd.f32 %v1210_v10, %v1125_v46  ;;  %v1300_v48 = vmax.f32 %v3589_v37, 0.0 }
 0x14d   :  { %v1233_v50 = vmax.f32 %v3599_v18, 0.0  ;;  %v1264_v55 = vmax.f32 %v3602_v31, 0.0  ;;  %v1271_v2 = vadd.f32 %v1268_v28, %v1237_v5 }
 0x14e   :  { %v1301_v19 = vmax.f32 %v3605_v13, 0.0  ;;  %v1223_v57 = vmul.f32 %v3518_v34, %v1211_v44  ;;  %v1254_v60 = vmul.f32 %v3522_v42, %v1211_v44  ;;  %v1291_v20 = vmul.f32 %v3525_v43, %v1211_v44 }
 0x14f   :  { %v1328_v63 = vmul.f32 %v3528_v45, %v1211_v44  ;;  %v1238_v4 = vmul.f32 %v3544_v32, %v1233_v50  ;;  %v1269_v52 = vmul.f32 %v3551_v33, %v1264_v55  ;;  %v1338_v1 = vmax.f32 %v3608_v9, 0.0 }
 0x150   :  { %v1226_v25 = vadd.f32 %v1223_v57, %v1218_v8  ;;  %v1257_v59 = vadd.f32 %v1254_v60, %v1249_v30  ;;  %v1294_v34 = vadd.f32 %v1291_v20, %v1286_v53  ;;  %v1337_v42 = vmax.f32 %v3613_v7, 0.0 }
 0x151   :  { %v1331_v10 = vadd.f32 %v1328_v63, %v1323_v56  ;;  %v1272_v43 = vadd.f32 %v1269_v52, %v1238_v4  ;;  %v1306_v45 = vmul.f32 %v3554_v49, %v1301_v19  ;;  %v1305_v39 = vmul.f32 %v3554_v49, %v1300_v48 }
 0x152   :  { %v1231_v61 = vadd.f32 %v3533_v47, %v1226_v25  ;;  %v1262_v0 = vadd.f32 %v3537_v51, %v1257_v59  ;;  %v1299_v8 = vadd.f32 %v3540_v54, %v1294_v34  ;;  %v1343_v41 = vmul.f32 %v3559_v6, %v1338_v1 }
 0x153   :  { %v3641_v12 = vadd.f32 %v3547_v58, %v1331_v10  ;;  %v1309_v23 = vadd.f32 %v1306_v45, %v1272_v43  ;;  %v1308_v30 = vadd.f32 %v1305_v39, %v1271_v2  ;;  %v1342_v47 = vmul.f32 %v3559_v6, %v1337_v42 }
 0x154   :  { %v1234_v5 = vmax.f32 %v1231_v61, 0.0  ;;  %v1265_v28 = vmax.f32 %v1262_v0, 0.0  ;;  %v1302_v46 = vmax.f32 %v1299_v8, 0.0  ;;  %v1241_v59 = vstv %s2500_s17 }
 0x155   :  { %v1346_v53 = vadd.f32 %v1343_v41, %v1309_v23  ;;  %v1339_v58 = vmax.f32 %v3641_v12, 0.0  ;;  %v1345_v56 = vadd.f32 %v1342_v47, %v1308_v30  ;;  %v1275_v34 = vstv %s2505_s18 }
 0x156   :  { %v1239_v51 = vmul.f32 %v3544_v32, %v1234_v5  ;;  %v1270_v54 = vmul.f32 %v3551_v33, %v1265_v28  ;;  %v1307_v57 = vmul.f32 %v3554_v49, %v1302_v46  ;;  %v1244_v10 = vmul.f32 %v1241_v59, %v1234_v5 }
 0x157   :  { %v3653_v60 = vand.u32 4294901760, %v1346_v53  ;;  %v1344_v63 = vmul.f32 %v3559_v6, %v1339_v58  ;;  %v3656_v4 = vand.u32 4294901760, %v1345_v56  ;;  %v1278_v43 = vmul.f32 %v1275_v34, %v1265_v28 }
 0x158   :  { %v1273_v44 = vadd.f32 %v1270_v54, %v1239_v51  ;;  %v1243_v41 = vmul.f32 %v1241_v59, %v1233_v50  ;;  %v1277_v30 = vmul.f32 %v1275_v34, %v1264_v55  ;;  %v1312_v5 = vstv %s2510_s19 }
 0x159   :  { %v3659_v32 = vsub.f32 %v1346_v53, %v3653_v60  ;;  %v3665_v25 = vsub.f32 %v1345_v56, %v3656_v4  ;;  %v1281_v23 = vadd.f32 %v1278_v43, %v1244_v10  ;;  %v1315_v53 = vmul.f32 %v1312_v5, %v1302_v46 }
 0x15a   :  { %v1310_v20 = vadd.f32 %v1307_v57, %v1273_v44  ;;  %v1242_v47 = vmul.f32 %v1241_v59, %v1232_v14  ;;  %v1276_v51 = vmul.f32 %v1275_v34, %v1263_v11  ;;  %v1349_v50 = vstv %s2515_s20 }
 0x15b   :  { %v1495_v6 = vand.u32 4294901760, %v3659_v32  ;;  %v1502_v39 = vand.u32 4294901760, %v3665_v25  ;;  %v1318_v31 = vadd.f32 %v1315_v53, %v1281_v23  ;;  %v1280_v55 = vadd.f32 %v1277_v30, %v1243_v41 }
 0x15c   :  { %v1347_v52 = vadd.f32 %v1344_v63, %v1310_v20  ;;  %v1352_v16 = vmul.f32 %v1349_v50, %v1339_v58  ;;  %v1314_v62 = vmul.f32 %v1312_v5, %v1301_v19  ;;  %v1279_v14 = vadd.f32 %v1276_v51, %v1242_v47 }
 0x15d   :  { %v1496_v0 = vsub.f32 %v3659_v32, %v1495_v6  ;;  %v1503_v12 = vsub.f32 %v3665_v25, %v1502_v39  ;;  %v1313_v54 = vmul.f32 %v1312_v5, %v1300_v48  ;;  %v1351_v13 = vmul.f32 %v1349_v50, %v1338_v1 }
 0x15e   :  { %v1359_v33 = vsel %vm87_vm0, %v1347_v52, 0  ;;  %v1355_v11 = vadd.f32 %v1352_v16, %v1318_v31  ;;  %v1317_v46 = vadd.f32 %v1314_v62, %v1280_v55  ;;  %v1350_v48 = vmul.f32 %v1349_v50, %v1337_v42 }
 0x15f   :  { %v3662_v2 = vand.u32 4294901760, %v1359_v33  ;;  %v1497_v28 = vand.u32 4294901760, %v1496_v0  ;;  %v1504_v18 = vand.u32 4294901760, %v1503_v12  ;;  %v1316_v19 = vadd.f32 %v1313_v54, %v1279_v14 }
 0x160   :  { %v1925_v58 = vsel %vm87_vm0, %v1355_v11, 0  ;;  %v1354_v37 = vadd.f32 %v1351_v13, %v1317_v46  ;;  %v1357_v34 = vstv %s1356_s21 }
 0x161   :  { %2845 = vmatpush3.msra.mxu0 %v3662_v2  ;;  %v3669_v49 = vsub.f32 %v1359_v33, %v3662_v2  ;;  %v3738_v9 = vand.u32 4294901760, %v1925_v58  ;;  %v1353_v1 = vadd.f32 %v1350_v48, %v1316_v19 }
 0x162   :  { %2846 = vmatprep.subr.mxu0 %v3088_v3  ;;  %v3745_v7 = vand.u32 4294901760, %v1354_v37 }
 0x163   :  { %2847 = vmatpush3.msra.mxu0 %v3653_v60  ;;  %v1488_v45 = vand.u32 4294901760, %v3669_v49  ;;  %v3754_v42 = vsub.f32 %v1925_v58, %v3738_v9  ;;  %v3756_v56 = vand.u32 4294901760, %v1353_v1 }
 0x164   :  { %2848 = vmatprep.subr.mxu0 %v3088_v3  ;;  %v3762_v44 = vsub.f32 %v1354_v37, %v3745_v7 }
 0x165   :  { %2849 = vmatpush3.msra.mxu0 %v3656_v4  ;;  %v1489_v61 = vsub.f32 %v3669_v49, %v1488_v45  ;;  %v3771_v57 = vsub.f32 %v1353_v1, %v3756_v56  ;;  %v2054_v20 = vand.u32 4294901760, %v3754_v42 }
 0x166   :  { %2851 = vmatmul.mubr.f32.vlgmr.msra.gmra.mxu0 %v3221_v36  ;;  %2874 = vmatprep.subr.mxu0 %v3088_v3  ;;  %v2061_v63 = vand.u32 4294901760, %v3762_v44 }
 0x167   :  { %2875 = vmatpush3.msra.mxu0 %v3669_v49  ;;  %2853 = vmatprep.mubr.msk.f32.mxu0 %vm3089_vm1, %v3088_v3  ;;  %v1490_v8 = vand.u32 4294901760, %v1489_v61  ;;  %v2068_v52 = vand.u32 4294901760, %v3771_v57 }
 0x168   :  { %2876 = vmatprep.subr.mxu0 %v3088_v3 }
 0x169   :  { %2860 = vmatpush3.msra.mxu1 %v1490_v8  ;;  %2877 = vmatpush3.msra.mxu0 %v3659_v32  ;;  %v2069_v33 = vsub.f32 %v3771_v57, %v2068_v52 }
 0x16a   :  { %2854 = vmatmul.mubr.f32.gmra.mxu0 %v3225_v38  ;;  %2861 = vmatprep.subr.mxu1 %v3088_v3 }
 0x16b   :  { %2878 = vmatprep.subr.mxu0 %v3088_v3  ;;  %2862 = vmatpush3.msra.mxu1 %v1497_v28 }
 0x16c   :  { %2879 = vmatpush3.msra.mxu0 %v3665_v25  ;;  %2863 = vmatprep.subr.mxu1 %v3088_v3  ;;  %v2070_v25 = vand.u32 4294901760, %v2069_v33 }
 0x16d   :  { %2856 = vmatprep.mubr.msk.f32.mxu0 %vm3089_vm1, %v3088_v3  ;;  %2864 = vmatpush3.msra.mxu1 %v1504_v18 }
 0x16e   :  { %2857 = vmatmul.mubr.f32.gmra.mxu0 %v3236_v40  ;;  %2866 = vmatmul.mubr.f32.vlgmr.msra.gmra.mxu1 %v3175_v15 }
 0x16f   :  { %2889 = vmatprep.subr.mxu1 %v3088_v3  ;;  %2868 = vmatprep.mubr.msk.f32.mxu1 %vm3089_vm1, %v3088_v3 }
 0x170   :  { %2890 = vmatpush3.msra.mxu1 %v3662_v2  ;;  %2880 = vmatprep.mubr.msk.f32.mxu0 %vm3089_vm1, %v3088_v3 }
 0x171   :  { %2891 = vmatprep.subr.mxu1 %v3088_v3  ;;  %2904 = vmatprep.subr.mxu0 %v3088_v3 }
 0x172   :  { %2892 = vmatpush3.msra.mxu1 %v3653_v60  ;;  %2881 = vmatmul.mubr.f32.vlgmr.msra.gmra.mxu0 %v3189_v22 }
 0x173   :  { %2869 = vmatmul.mubr.f32.gmra.mxu1 %v3180_v17  ;;  %2893 = vmatprep.subr.mxu1 %v3088_v3 }
 0x174   :  { %2905 = vmatpush3.msra.mxu0 %v1488_v45  ;;  %2894 = vmatpush3.msra.mxu1 %v3656_v4 }
 0x175   :  { %2906 = vmatprep.subr.mxu0 %v3088_v3  ;;  %2871 = vmatprep.mubr.msk.f32.mxu1 %vm3089_vm1, %v3088_v3 }
 0x176   :  { %2907 = vmatpush3.msra.mxu0 %v1495_v6  ;;  %2883 = vmatprep.mubr.msk.f32.mxu0 %vm3089_vm1, %v3088_v3 }
 0x177   :  { %2908 = vmatprep.subr.mxu0 %v3088_v3  ;;  %2872 = vmatmul.mubr.f32.gmra.mxu1 %v3185_v21 }
 0x178   :  { %2884 = vmatmul.mubr.f32.gmra.mxu0 %v3193_v24  ;;  %2895 = vmatprep.mubr.msk.f32.mxu1 %vm3089_vm1, %v3088_v3 }
 0x179   :  { %2909 = vmatpush3.msra.mxu0 %v1502_v39  ;;  %2886 = vmatprep.mubr.msk.f32.mxu0 %vm3089_vm1, %v3088_v3 }
 0x17a   :  { %2919 = vmatprep.subr.mxu1 %v3088_v3  ;;  %2934 = vmatprep.subr.mxu0 %v3088_v3 }
 0x17b   :  { %2896 = vmatmul.mubr.f32.vlgmr.msra.gmra.mxu1 %v3204_v27 }
 0x17c   :  { %2887 = vmatmul.mubr.f32.gmra.mxu0 %v3200_v26  ;;  %2920 = vmatpush3.msra.mxu1 %v3662_v2 }
 0x17d   :  { %2921 = vmatprep.subr.mxu1 %v3088_v3  ;;  %2898 = vmatprep.mubr.msk.f32.mxu1 %vm3089_vm1, %v3088_v3 }
 0x17e   :  { %2922 = vmatpush3.msra.mxu1 %v3653_v60  ;;  %2910 = vmatprep.mubr.msk.f32.mxu0 %vm3089_vm1, %v3088_v3  ;;  %v2055_v60 = vsub.f32 %v3754_v42, %v2054_v20 }
 0x17f   :  { %2923 = vmatprep.subr.mxu1 %v3088_v3  ;;  %2899 = vmatmul.mubr.f32.gmra.mxu1 %v3208_v29 }
 0x180   :  { %2911 = vmatmul.mubr.f32.vlgmr.msra.gmra.mxu0 %v3175_v15  ;;  %2924 = vmatpush3.msra.mxu1 %v3656_v4  ;;  %v2062_v4 = vsub.f32 %v3762_v44, %v2061_v63  ;;  %v2056_v32 = vand.u32 4294901760, %v2055_v60 }
 0x181   :  { %2935 = vmatpush3.msra.mxu0 %v3738_v9  ;;  %2901 = vmatprep.mubr.msk.f32.mxu1 %vm3089_vm1, %v3088_v3 }
 0x182   :  { %2936 = vmatprep.subr.mxu0 %v3088_v3  ;;  %2913 = vmatprep.mubr.msk.f32.mxu0 %vm3089_vm1, %v3088_v3  ;;  %v2063_v2 = vand.u32 4294901760, %v2062_v4 }
 0x183   :  { %2937 = vmatpush3.msra.mxu0 %v3745_v7  ;;  %2902 = vmatmul.mubr.f32.gmra.mxu1 %v3219_v35 }
 0x184   :  { %2938 = vmatprep.subr.mxu0 %v3088_v3  ;;  %2914 = vmatmul.mubr.f32.gmra.mxu0 %v3180_v17 }
 0x185   :  { %2939 = vmatpush3.msra.mxu0 %v3756_v56  ;;  %2916 = vmatprep.mubr.msk.f32.mxu0 %vm3089_vm1, %v3088_v3 }
 0x186   :  { %2925 = vmatprep.mubr.msk.f32.mxu1 %vm3089_vm1, %v3088_v3  ;;  %2949 = vmatprep.subr.mxu1 %v3088_v3 }
 0x187   :  { %2926 = vmatmul.mubr.f32.vlgmr.msra.gmra.mxu1 %v3175_v15  ;;  %2964 = vmatprep.subr.mxu0 %v3088_v3 }
 0x188   :  { %2917 = vmatmul.mubr.f32.gmra.mxu0 %v3185_v21  ;;  %2950 = vmatpush3.msra.mxu1 %v2056_v32 }
 0x189   :  { %2951 = vmatprep.subr.mxu1 %v3088_v3  ;;  %2928 = vmatprep.mubr.msk.f32.mxu1 %vm3089_vm1, %v3088_v3 }
 0x18a   :  { %2952 = vmatpush3.msra.mxu1 %v2063_v2  ;;  %2940 = vmatprep.mubr.msk.f32.mxu0 %vm3089_vm1, %v3088_v3 }
 0x18b   :  { %2953 = vmatprep.subr.mxu1 %v3088_v3  ;;  %2929 = vmatmul.mubr.f32.gmra.mxu1 %v3180_v17 }
 0x18c   :  { %2941 = vmatmul.mubr.f32.vlgmr.msra.gmra.mxu0 %v3221_v36  ;;  %2954 = vmatpush3.msra.mxu1 %v2070_v25 }
 0x18d   :  { %2965 = vmatpush3.msra.mxu0 %v3754_v42  ;;  %2931 = vmatprep.mubr.msk.f32.mxu1 %vm3089_vm1, %v3088_v3 }
 0x18e   :  { %2966 = vmatprep.subr.mxu0 %v3088_v3  ;;  %2943 = vmatprep.mubr.msk.f32.mxu0 %vm3089_vm1, %v3088_v3 }
 0x18f   :  { %2967 = vmatpush3.msra.mxu0 %v3762_v44  ;;  %2932 = vmatmul.mubr.f32.gmra.mxu1 %v3185_v21 }
 0x190   :  { %2968 = vmatprep.subr.mxu0 %v3088_v3  ;;  %2944 = vmatmul.mubr.f32.gmra.mxu0 %v3225_v38 }
 0x191   :  { %2969 = vmatpush3.msra.mxu0 %v3771_v57  ;;  %2946 = vmatprep.mubr.msk.f32.mxu0 %vm3089_vm1, %v3088_v3 }
 0x192   :  { %2955 = vmatprep.mubr.msk.f32.mxu1 %vm3089_vm1, %v3088_v3  ;;  %2979 = vmatprep.subr.mxu1 %v3088_v3 }
 0x193   :  { %2956 = vmatmul.mubr.f32.vlgmr.msra.gmra.mxu1 %v3175_v15  ;;  %2994 = vmatprep.subr.mxu0 %v3088_v3 }
 0x194   :  { %2947 = vmatmul.mubr.f32.gmra.mxu0 %v3236_v40  ;;  %2980 = vmatpush3.msra.mxu1 %v3738_v9 }
 0x195   :  { %2981 = vmatprep.subr.mxu1 %v3088_v3  ;;  %2958 = vmatprep.mubr.msk.f32.mxu1 %vm3089_vm1, %v3088_v3 }
 0x196   :  { %2982 = vmatpush3.msra.mxu1 %v3745_v7  ;;  %2970 = vmatprep.mubr.msk.f32.mxu0 %vm3089_vm1, %v3088_v3 }
 0x197   :  { %2983 = vmatprep.subr.mxu1 %v3088_v3  ;;  %2959 = vmatmul.mubr.f32.gmra.mxu1 %v3180_v17 }
 0x198   :  { %2971 = vmatmul.mubr.f32.vlgmr.msra.gmra.mxu0 %v3189_v22  ;;  %2984 = vmatpush3.msra.mxu1 %v3756_v56 }
 0x199   :  { %2995 = vmatpush3.msra.mxu0 %v2054_v20  ;;  %2961 = vmatprep.mubr.msk.f32.mxu1 %vm3089_vm1, %v3088_v3 }
 0x19a   :  { %2996 = vmatprep.subr.mxu0 %v3088_v3  ;;  %2973 = vmatprep.mubr.msk.f32.mxu0 %vm3089_vm1, %v3088_v3 }
 0x19b   :  { %2997 = vmatpush3.msra.mxu0 %v2061_v63  ;;  %2962 = vmatmul.mubr.f32.gmra.mxu1 %v3185_v21 }
 0x19c   :  { %2998 = vmatprep.subr.mxu0 %v3088_v3  ;;  %2974 = vmatmul.mubr.f32.gmra.mxu0 %v3193_v24 }
 0x19d   :  { %2999 = vmatpush3.msra.mxu0 %v2068_v52  ;;  %2976 = vmatprep.mubr.msk.f32.mxu0 %vm3089_vm1, %v3088_v3 }
 0x19e   :  { %2985 = vmatprep.mubr.msk.f32.mxu1 %vm3089_vm1, %v3088_v3  ;;  %3009 = vmatprep.subr.mxu1 %v3088_v3 }
 0x19f   :  { %2986 = vmatmul.mubr.f32.vlgmr.msra.gmra.mxu1 %v3204_v27 }
 0x1a0   :  { %2977 = vmatmul.mubr.f32.gmra.mxu0 %v3200_v26  ;;  %3010 = vmatpush3.msra.mxu1 %v3738_v9 }
 0x1a1   :  { %3011 = vmatprep.subr.mxu1 %v3088_v3  ;;  %2988 = vmatprep.mubr.msk.f32.mxu1 %vm3089_vm1, %v3088_v3 }
 0x1a2   :  { %3012 = vmatpush3.msra.mxu1 %v3745_v7  ;;  %3000 = vmatprep.mubr.msk.f32.mxu0 %vm3089_vm1, %v3088_v3 }
 0x1a3   :  { %3013 = vmatprep.subr.mxu1 %v3088_v3  ;;  %2989 = vmatmul.mubr.f32.gmra.mxu1 %v3208_v29 }
 0x1a4   :  { %3001 = vmatmul.mubr.f32.vlgmr.msra.gmra.mxu0 %v3175_v15  ;;  %3014 = vmatpush3.msra.mxu1 %v3756_v56 }
 0x1a5   :  { %2991 = vmatprep.mubr.msk.f32.mxu1 %vm3089_vm1, %v3088_v3  ;;  %3003 = vmatprep.mubr.msk.f32.mxu0 %vm3089_vm1, %v3088_v3 }
 0x1a7   :  { %2992 = vmatmul.mubr.f32.gmra.mxu1 %v3219_v35 }
 0x1a8   :  { %3004 = vmatmul.mubr.f32.gmra.mxu0 %v3180_v17  ;;  %3015 = vmatprep.mubr.msk.f32.mxu1 %vm3089_vm1, %v3088_v3 }
 0x1a9   :  { %3006 = vmatprep.mubr.msk.f32.mxu0 %vm3089_vm1, %v3088_v3 }
 0x1ab   :  { %3016 = vmatmul.mubr.f32.vlgmr.msra.gmra.mxu1 %v3175_v15 }
 0x1ac   :  { %3007 = vmatmul.mubr.f32.gmra.mxu0 %v3185_v21  ;;  %3018 = vmatprep.mubr.msk.f32.mxu1 %vm3089_vm1, %v3088_v3 }
 0x1af   :  { %3019 = vmatmul.mubr.f32.gmra.mxu1 %v3180_v17 }
 0x1b0   :  { %3021 = vmatprep.mubr.msk.f32.mxu1 %vm3089_vm1, %v3088_v3 }
 0x1b3   :  { %3022 = vmatmul.mubr.f32.gmra.mxu1 %v3185_v21 }
 0x226   :  { %v1435_v22 = vpop.f32.mrf.mxu0 }
 0x227   :  { %v1436_v21 = vadd.f32 %v1435_v22, %v1357_v34 }
 0x228   :  { %v2852_v24 = vpop.f32.mrf.mxu0 }
 0x22a   :  { %v1445_v26 = vpop.f32.mrf.mxu0 }
 0x22b   :  { %v1446_v8 = vadd.f32 %v1445_v26, %v1357_v34 }
 0x22c   :  { %v2855_v27 = vpop.f32.mrf.mxu0 }
 0x22e   :  { %v1455_v29 = vpop.f32.mrf.mxu0  ;;  %v1541_v35 = vpop.f32.mrf.mxu1 }
 0x22f   :  { %v1542_v12 = vadd.f32 %v1541_v35, %v1436_v21  ;;  %v1456_v53 = vadd.f32 %v1455_v29, %v1357_v34  ;;  %v1923_v35 = vstv %s2516_s27 }
 0x230   :  { %v2858_v36 = vpop.f32.mrf.mxu0  ;;  %v2867_v15 = vpop.f32.mrf.mxu1 }
 0x232   :  { %v1631_v38 = vpop.f32.mrf.mxu0 }
 0x233   :  { %v1547_v40 = vpop.f32.mrf.mxu1  ;;  %v1632_v30 = vadd.f32 %v1631_v38, %v1542_v12 }
 0x234   :  { %v2882_v49 = vpop.f32.mrf.mxu0  ;;  %v1548_v47 = vadd.f32 %v1547_v40, %v1446_v8 }
 0x235   :  { %v2870_v6 = vpop.f32.mrf.mxu1 }
 0x237   :  { %v1553_v59 = vpop.f32.mrf.mxu1 }
 0x238   :  { %v1638_v17 = vpop.f32.mrf.mxu0  ;;  %v1554_v14 = vadd.f32 %v1553_v59, %v1456_v53 }
 0x239   :  { %v2873_v10 = vpop.f32.mrf.mxu1  ;;  %v1639_v50 = vadd.f32 %v1638_v17, %v1548_v47 }
 0x23a   :  { %v2885_v3 = vpop.f32.mrf.mxu0 }
 0x23b   :  { %v1721_v43 = vpop.f32.mrf.mxu1 }
 0x23c   :  { %v1645_v45 = vpop.f32.mrf.mxu0  ;;  %v1722_v51 = vadd.f32 %v1721_v43, %v1632_v30 }
 0x23d   :  { %v2897_v39 = vpop.f32.mrf.mxu1  ;;  %v1646_v19 = vadd.f32 %v1645_v45, %v1554_v14 }
 0x23e   :  { %v2888_v61 = vpop.f32.mrf.mxu0 }
 0x23f   :  { %v1729_v0 = vpop.f32.mrf.mxu1 }
 0x240   :  { %v1817_v23 = vpop.f32.mrf.mxu0  ;;  %v1730_v11 = vadd.f32 %v1729_v0, %v1639_v50 }
 0x241   :  { %v2900_v41 = vpop.f32.mrf.mxu1  ;;  %v1818_v55 = vadd.f32 %v1817_v23, %v1722_v51 }
 0x242   :  { %v2912_v5 = vpop.f32.mrf.mxu0 }
 0x243   :  { %v1737_v28 = vpop.f32.mrf.mxu1 }
 0x244   :  { %v1823_v18 = vpop.f32.mrf.mxu0  ;;  %v1738_v9 = vadd.f32 %v1737_v28, %v1646_v19 }
 0x245   :  { %v2903_v31 = vpop.f32.mrf.mxu1  ;;  %v1824_v58 = vadd.f32 %v1823_v18, %v1730_v11 }
 0x246   :  { %v2915_v16 = vpop.f32.mrf.mxu0 }
 0x247   :  { %v1903_v62 = vpop.f32.mrf.mxu1 }
 0x248   :  { %v1829_v46 = vpop.f32.mrf.mxu0  ;;  %v1904_v54 = vadd.f32 %v1903_v62, %v1818_v55 }
 0x249   :  { %v2927_v13 = vpop.f32.mrf.mxu1  ;;  %v1830_v56 = vadd.f32 %v1829_v46, %v1738_v9 }
 0x24a   :  { %1919 = vst [vmem:[%s3908_s6] sm:$0xff] %v1904_v54  ;;  %v2918_v37 = vpop.f32.mrf.mxu0 }
 0x24b   :  { %v1909_v48 = vpop.f32.mrf.mxu1 }
 0x24c   :  { %v1910_v1 = vadd.f32 %v1909_v48, %v1824_v58  ;;  %v2001_v7 = vpop.f32.mrf.mxu0 }
 0x24d   :  { %v2930_v42 = vpop.f32.mrf.mxu1  ;;  %v2002_v40 = vadd.f32 %v2001_v7, %v1923_v35 }
 0x24e   :  { %1920 = vst [vmem:[%s3908_s6 + $0x8] sm:$0xff] %v1910_v1  ;;  %v2942_v44 = vpop.f32.mrf.mxu0 }
 0x24f   :  { %v1915_v57 = vpop.f32.mrf.mxu1 }
 0x250   :  { %v1916_v20 = vadd.f32 %v1915_v57, %v1830_v56  ;;  %v2011_v63 = vpop.f32.mrf.mxu0 }
 0x251   :  { %v2933_v60 = vpop.f32.mrf.mxu1  ;;  %v2012_v34 = vadd.f32 %v2011_v63, %v1923_v35 }
 0x252   :  { %1921 = vst [vmem:[%s3908_s6 + $0x10] sm:$0x1f] %v1916_v20  ;;  %v2945_v52 = vpop.f32.mrf.mxu0 }
 0x253   :  { %v2107_v4 = vpop.f32.mrf.mxu1 }
 0x254   :  { %v2021_v32 = vpop.f32.mrf.mxu0  ;;  %v2108_v10 = vadd.f32 %v2107_v4, %v2002_v40 }
 0x255   :  { %v2957_v33 = vpop.f32.mrf.mxu1  ;;  %v2022_v61 = vadd.f32 %v2021_v32, %v1923_v35 }
 0x256   :  { %v2948_v2 = vpop.f32.mrf.mxu0 }
 0x257   :  { %v2113_v25 = vpop.f32.mrf.mxu1 }
 0x258   :  { %v2197_v22 = vpop.f32.mrf.mxu0  ;;  %v2114_v0 = vadd.f32 %v2113_v25, %v2012_v34 }
 0x259   :  { %v2960_v24 = vpop.f32.mrf.mxu1  ;;  %v2198_v21 = vadd.f32 %v2197_v22, %v2108_v10 }
 0x25a   :  { %v2972_v26 = vpop.f32.mrf.mxu0 }
 0x25b   :  { %v2119_v27 = vpop.f32.mrf.mxu1 }
 0x25c   :  { %v2204_v29 = vpop.f32.mrf.mxu0  ;;  %v2120_v53 = vadd.f32 %v2119_v27, %v2022_v61 }
 0x25d   :  { %v2963_v36 = vpop.f32.mrf.mxu1  ;;  %v2205_v41 = vadd.f32 %v2204_v29, %v2114_v0 }
 0x25e   :  { %v2975_v15 = vpop.f32.mrf.mxu0 }
 0x25f   :  { %v2287_v38 = vpop.f32.mrf.mxu1 }
 0x260   :  { %v2211_v49 = vpop.f32.mrf.mxu0  ;;  %v2288_v8 = vadd.f32 %v2287_v38, %v2198_v21 }
 0x261   :  { %v2987_v6 = vpop.f32.mrf.mxu1  ;;  %v2212_v50 = vadd.f32 %v2211_v49, %v2120_v53 }
 0x262   :  { %v2978_v59 = vpop.f32.mrf.mxu0 }
 0x263   :  { %v2295_v17 = vpop.f32.mrf.mxu1 }
 0x264   :  { %v2383_v3 = vpop.f32.mrf.mxu0  ;;  %v2296_v47 = vadd.f32 %v2295_v17, %v2205_v41 }
 0x265   :  { %v2990_v43 = vpop.f32.mrf.mxu1  ;;  %v2384_v30 = vadd.f32 %v2383_v3, %v2288_v8 }
 0x266   :  { %v3002_v45 = vpop.f32.mrf.mxu0 }
 0x267   :  { %v2303_v39 = vpop.f32.mrf.mxu1 }
 0x268   :  { %v2389_v12 = vpop.f32.mrf.mxu0  ;;  %v2304_v14 = vadd.f32 %v2303_v39, %v2212_v50 }
 0x269   :  { %v2993_v23 = vpop.f32.mrf.mxu1  ;;  %v2390_v55 = vadd.f32 %v2389_v12, %v2296_v47 }
 0x26a   :  { %v3005_v5 = vpop.f32.mrf.mxu0 }
 0x26b   :  { %v2469_v28 = vpop.f32.mrf.mxu1 }
 0x26c   :  { %v2395_v51 = vpop.f32.mrf.mxu0  ;;  %v2470_v18 = vadd.f32 %v2469_v28, %v2384_v30 }
 0x26d   :  { %v3017_v31 = vpop.f32.mrf.mxu1  ;;  %v2396_v54 = vadd.f32 %v2395_v51, %v2304_v14 }
 0x26e   :  { %2517 = vst [vmem:[%s3908_s6 + $0x18] sm:$0xff] %v2470_v18  ;;  %v3008_v16 = vpop.f32.mrf.mxu0 }
 0x26f   :  { %v2475_v62 = vpop.f32.mrf.mxu1 }
 0x270   :  { %v2476_v11 = vadd.f32 %v2475_v62, %v2390_v55 }
 0x271   :  { %v3020_v46 = vpop.f32.mrf.mxu1 }
 0x272   :  { %2518 = vst [vmem:[%s3908_s6 + $0x20] sm:$0xff] %v2476_v11 }
 0x273   :  { %v2481_v13 = vpop.f32.mrf.mxu1 }
 0x274   :  { %v2482_v19 = vadd.f32 %v2481_v13, %v2396_v54 }
 0x275   :  { %v3023_v58 = vpop.f32.mrf.mxu1 }
 0x276   :  { %2519 = vst [vmem:[%s3908_s6 + $0x28] sm:$0x1f] %v2482_v19 }
 0x277   :  { %2493 = vsyncpa [#allocation3], 1 }
 0x278   :  { %2494 = vsyncpa [#allocation5], 1 }
 0x279   :  { %2495 = vsyncpa [#allocation8], 1 }

</bundles_post_ra>
